<compile_context>
chip_gen: v5e
topology: v5e:2x2
jax: 0.10.0
libtpu: 0.0.40
codegen_flags: <defaults>
</compile_context>

<pallas_src>
import jax
import jax.numpy as jnp
from jax.experimental import pallas as pl
from jax.experimental.pallas import tpu as pltpu


def _round_up(x, m):
    return ((x + m - 1) // m) * m


def _discriminator_kernel(x_ref, w1_ref, w2_ref, w3_ref,
                          b1_ref, b2_ref, b3_ref, o_ref):
    """One batch tile of the 3-layer MLP.

    x_ref : (TB, num_hid)  bf16 (or f32) feature tile
    w1_ref: (num_hid, h1)  bf16   VMEM-resident
    w2_ref: (h1, h2)       bf16   VMEM-resident
    w3_ref: (1, h2)        f32    final layer as a row vector
    b1/b2 : (1, h1)/(1, h2) f32
    b3    : (1, 1)         f32
    o_ref : (1, TB)        f32    lane-dense logits row
    """
    x = x_ref[...]
    if x.dtype != jnp.bfloat16:      # fallback for f32 producers
        x = x.astype(jnp.bfloat16)

    # Layer 1: Linear(num_hid -> num_hid//4) + ReLU (bf16 MXU, f32 accumulate).
    h1 = jnp.dot(x, w1_ref[...], preferred_element_type=jnp.float32) + b1_ref[...]
    h1 = jnp.maximum(h1, 0.0)

    # Layer 2: Linear(num_hid//4 -> num_hid//16) + ReLU.
    h2 = jnp.dot(h1.astype(jnp.bfloat16), w2_ref[...],
                 preferred_element_type=jnp.float32) + b2_ref[...]
    h2 = jnp.maximum(h2, 0.0)

    # Layer 3: Linear(num_hid//16 -> 1).  Contract (1, h2) with (TB, h2)^T so
    # the result lands lane-dense as (1, TB) -- no (TB, 1) masked stores.
    logits = jax.lax.dot_general(
        w3_ref[...], h2,
        dimension_numbers=(((1,), (1,)), ((), ())),
        preferred_element_type=jnp.float32)               # (1, TB)
    o_ref[...] = (logits + b3_ref[...]).astype(o_ref.dtype)


def discriminator_forward(features, params, *, target_tile_bytes=None):
    """features: (B, num_hid) bf16 (preferred) or f32; params: w1,b1,w2,b2,w3,b3."""
    w1 = params["w1"].astype(jnp.bfloat16)                  # (num_hid, h1)
    w2 = params["w2"].astype(jnp.bfloat16)                  # (h1, h2)
    w3_row = params["w3"].reshape(1, -1).astype(jnp.float32)  # (1, h2)
    b1 = params["b1"].reshape(1, -1).astype(jnp.float32)
    b2 = params["b2"].reshape(1, -1).astype(jnp.float32)
    b3 = params["b3"].reshape(1, -1).astype(jnp.float32)

    B, num_hid = features.shape
    h1_dim, h2_dim = w1.shape[1], w2.shape[1]
    assert num_hid % 16 == 0, "num_hid must be divisible by 16"
    assert h1_dim == num_hid // 4 and h2_dim == num_hid // 16

    # Per-chip VMEM capacity (v5e/v6e: 128 MiB, v7x: 64 MiB per TC).
    try:
        chip_vmem = int(getattr(pltpu.get_tpu_info(), "vmem_capacity_bytes",
                                64 << 20))
    except Exception:
        chip_vmem = 64 << 20
    vmem_cap = int(0.8 * chip_vmem)

    # Batch tile: target a few MiB per feature buffer, scaled to the chip.
    feat_bytes = features.dtype.itemsize
    if target_tile_bytes is None:
        target_tile_bytes = (4 << 20) if chip_vmem >= (96 << 20) else (2 << 20)
    tb = target_tile_bytes // (num_hid * feat_bytes)
    tb = max(256, min(4096, (tb // 128) * 128))     # multiple of 128 if tiled
    b_aligned = _round_up(B, 8)
    if b_aligned <= tb:
        tb = b_aligned                              # single tile, no padding copy
    n_tiles = pl.cdiv(B, tb)                        # ragged last tile handled by
    out_cols = n_tiles * tb                         # Mosaic's block masking

    def _vmem_estimate(const_factor):
        const_b = (w1.size * 2 + w2.size * 2
                   + (w3_row.size + b1.size + b2.size + b3.size) * 4)
        x_b = 2 * tb * num_hid * feat_bytes         # double-buffered feature tile
        o_b = 2 * tb * 4                            # double-buffered output row
        inter = tb * (num_hid * 2 + h1_dim * 8 + h2_dim * 4)
        return const_factor * const_b + x_b + o_b + 2 * inter + (4 << 20)

    def _run(single_buffer_consts):
        def const_spec(shape):
            if single_buffer_consts:
                return pl.BlockSpec(shape, lambda i: (0, 0),
                                    pipeline_mode=pl.Buffered(1))
            return pl.BlockSpec(shape, lambda i: (0, 0))

        vmem_limit = int(min(max(_vmem_estimate(1 if single_buffer_consts else 2),
                                 32 << 20), vmem_cap))
        return pl.pallas_call(
            _discriminator_kernel,
            out_shape=jax.ShapeDtypeStruct((1, out_cols), jnp.float32),
            grid=(n_tiles,),
            in_specs=[
                pl.BlockSpec((tb, num_hid), lambda i: (i, 0)),   # feature tile
                const_spec(w1.shape),
                const_spec(w2.shape),
                const_spec(w3_row.shape),
                const_spec(b1.shape),
                const_spec(b2.shape),
                const_spec(b3.shape),
            ],
            out_specs=pl.BlockSpec((1, tb), lambda i: (0, i)),   # lane-dense
            compiler_params=pltpu.CompilerParams(
                dimension_semantics=("parallel",),
                vmem_limit_bytes=vmem_limit),
        )(features, w1, w2, w3_row, b1, b2, b3)

    try:
        out_row = _run(True)
    except Exception:
        # Graceful fallback if pl.Buffered(1) is unsupported on this JAX build.
        out_row = _run(False)

    return out_row[0, :B].reshape(B, 1)


def init_discriminator_params(key, num_hid):
    """Deterministic init mirroring torch nn.Linear (stored transposed)."""
    h1 = num_hid // 4
    h2 = num_hid // 16
    k1, k2, k3 = jax.random.split(key, 3)

    def linear_init(k, fan_in, fan_out):
        kw, kb = jax.random.split(k)
        bound = 1.0 / jnp.sqrt(jnp.float32(fan_in))
        w = jax.random.uniform(kw, (fan_in, fan_out), jnp.float32,
                               minval=-bound, maxval=bound)
        b = jax.random.uniform(kb, (1, fan_out), jnp.float32,
                               minval=-bound, maxval=bound)
        return w, b

    w1, b1 = linear_init(k1, num_hid, h1)
    w2, b2 = linear_init(k2, h1, h2)
    w3, b3 = linear_init(k3, h2, 1)
    return {"w1": w1, "b1": b1, "w2": w2, "b2": b2, "w3": w3, "b3": b3}


def reference_forward_f32(features, params):
    x = features.astype(jnp.float32)
    h1 = jnp.maximum(x @ params["w1"] + params["b1"], 0.0)
    h2 = jnp.maximum(h1 @ params["w2"] + params["b2"], 0.0)
    return h2 @ params["w3"] + params["b3"]


def reference_forward_bf16(features, params):
    """Reference mirroring the kernel's bf16-operand / f32-accumulate math."""
    w1 = params["w1"].astype(jnp.bfloat16)
    w2 = params["w2"].astype(jnp.bfloat16)
    h1 = jnp.maximum(
        jnp.dot(features.astype(jnp.bfloat16), w1,
                preferred_element_type=jnp.float32) + params["b1"], 0.0)
    h2 = jnp.maximum(
        jnp.dot(h1.astype(jnp.bfloat16), w2,
                preferred_element_type=jnp.float32) + params["b2"], 0.0)
    return h2 @ params["w3"] + params["b3"]


def _check(features, params, **kw):
    out = jax.block_until_ready(discriminator_forward(features, params, **kw))
    assert out.shape == (features.shape[0], 1), out.shape
    ref_bf16 = reference_forward_bf16(features, params)
    ref_f32 = reference_forward_f32(features, params)
    assert jnp.allclose(out, ref_bf16, atol=5e-3, rtol=5e-3), \
        "mismatch vs bf16-matched reference"
    assert jnp.allclose(out, ref_f32, atol=5e-2, rtol=5e-2), \
        "mismatch vs f32 reference"
    return out


if __name__ == "__main__":
    key = jax.random.PRNGKey(0)
    k_feat, k_params, k_feat2, k_params2 = jax.random.split(key, 4)

    # Small case: batch=8, num_hid=64 -> hidden sizes 16, 4, 1.
    batch, num_hid = 8, 64
    features = jax.random.normal(k_feat, (batch, num_hid), jnp.bfloat16)
    params = init_discriminator_params(k_params, num_hid)
    _check(features, params)

    # Ragged, multi-tile case (forced small tile): exercises the no-pad path
    # with a partial final batch tile and the lane-dense output slab.
    batch2, num_hid2 = 600, 256
    features2 = jax.random.normal(k_feat2, (batch2, num_hid2), jnp.bfloat16)
    params2 = init_discriminator_params(k_params2, num_hid2)
    _check(features2, params2, target_tile_bytes=64 << 10)

    print("KERNEL_OK")
</pallas_src>

<mosaic_0001>
module attributes {stable_mosaic.version = 11 : i64} {
  func.func @_discriminator_kernel(%arg0: i32, %arg1: memref<8x64xbf16, #tpu.memory_space<vmem>>, %arg2: memref<64x16xbf16, #tpu.memory_space<vmem>>, %arg3: memref<16x4xbf16, #tpu.memory_space<vmem>>, %arg4: memref<1x4xf32, #tpu.memory_space<vmem>>, %arg5: memref<1x16xf32, #tpu.memory_space<vmem>>, %arg6: memref<1x4xf32, #tpu.memory_space<vmem>>, %arg7: memref<1x1xf32, #tpu.memory_space<vmem>>, %arg8: memref<1x8xf32, #tpu.memory_space<vmem>>) attributes {dimension_semantics = [#tpu.dimension_semantics<parallel>], iteration_bounds = array<i64: 1>, scalar_prefetch = 0 : i64, scratch_operands = 0 : i64, tpu.core_type = #tpu.core_type<tc>, window_params = [{transform_indices = @transform_0, window_bounds = array<i64: 8, 64>}, {pipeline_mode = #tpu.pipeline_mode<synchronous>, transform_indices = @transform_1, window_bounds = array<i64: 64, 16>}, {pipeline_mode = #tpu.pipeline_mode<synchronous>, transform_indices = @transform_2, window_bounds = array<i64: 16, 4>}, {pipeline_mode = #tpu.pipeline_mode<synchronous>, transform_indices = @transform_3, window_bounds = array<i64: 1, 4>}, {pipeline_mode = #tpu.pipeline_mode<synchronous>, transform_indices = @transform_4, window_bounds = array<i64: 1, 16>}, {pipeline_mode = #tpu.pipeline_mode<synchronous>, transform_indices = @transform_5, window_bounds = array<i64: 1, 4>}, {pipeline_mode = #tpu.pipeline_mode<synchronous>, transform_indices = @transform_6, window_bounds = array<i64: 1, 1>}, {transform_indices = @transform_7, window_bounds = array<i64: 1, 8>}]} {
    %c0 = arith.constant 0 : index
    %c0_0 = arith.constant 0 : index
    %0 = vector.load %arg1[%c0, %c0_0] : memref<8x64xbf16, #tpu.memory_space<vmem>>, vector<8x64xbf16>
    %c0_1 = arith.constant 0 : index
    %c0_2 = arith.constant 0 : index
    %1 = vector.load %arg2[%c0_1, %c0_2] : memref<64x16xbf16, #tpu.memory_space<vmem>>, vector<64x16xbf16>
    %cst = arith.constant dense<0.000000e+00> : vector<8x16xf32>
    %2 = tpu.matmul %0, %1, %cst {dimension_numbers = #tpu.dot_dimension_numbers<[1], [0], [0], [1], [0, 0, 1, 1], [], []>} : vector<8x64xbf16>, vector<64x16xbf16>, vector<8x16xf32> -> vector<8x16xf32>
    %c0_3 = arith.constant 0 : index
    %c0_4 = arith.constant 0 : index
    %3 = vector.load %arg5[%c0_3, %c0_4] : memref<1x16xf32, #tpu.memory_space<vmem>>, vector<1x16xf32>
    %4 = vector.broadcast %3 : vector<1x16xf32> to vector<8x16xf32>
    %5 = arith.addf %2, %4 : vector<8x16xf32>
    %cst_5 = arith.constant 0.000000e+00 : f32
    %6 = vector.broadcast %cst_5 : f32 to vector<8x16xf32>
    %7 = arith.maximumf %5, %6 : vector<8x16xf32>
    %8 = arith.truncf %7 : vector<8x16xf32> to vector<8x16xbf16>
    %c0_6 = arith.constant 0 : index
    %c0_7 = arith.constant 0 : index
    %9 = vector.load %arg3[%c0_6, %c0_7] : memref<16x4xbf16, #tpu.memory_space<vmem>>, vector<16x4xbf16>
    %cst_8 = arith.constant dense<0.000000e+00> : vector<8x4xf32>
    %10 = tpu.matmul %8, %9, %cst_8 {dimension_numbers = #tpu.dot_dimension_numbers<[1], [0], [0], [1], [0, 0, 1, 1], [], []>} : vector<8x16xbf16>, vector<16x4xbf16>, vector<8x4xf32> -> vector<8x4xf32>
    %c0_9 = arith.constant 0 : index
    %c0_10 = arith.constant 0 : index
    %11 = vector.load %arg6[%c0_9, %c0_10] : memref<1x4xf32, #tpu.memory_space<vmem>>, vector<1x4xf32>
    %12 = vector.broadcast %11 : vector<1x4xf32> to vector<8x4xf32>
    %13 = arith.addf %10, %12 : vector<8x4xf32>
    %cst_11 = arith.constant 0.000000e+00 : f32
    %14 = vector.broadcast %cst_11 : f32 to vector<8x4xf32>
    %15 = arith.maximumf %13, %14 : vector<8x4xf32>
    %c0_12 = arith.constant 0 : index
    %c0_13 = arith.constant 0 : index
    %16 = vector.load %arg4[%c0_12, %c0_13] : memref<1x4xf32, #tpu.memory_space<vmem>>, vector<1x4xf32>
    %cst_14 = arith.constant dense<0.000000e+00> : vector<1x8xf32>
    %17 = tpu.matmul %16, %15, %cst_14 {dimension_numbers = #tpu.dot_dimension_numbers<[1], [1], [0], [0], [0, 0, 1, 0], [], []>} : vector<1x4xf32>, vector<8x4xf32>, vector<1x8xf32> -> vector<1x8xf32>
    %c0_15 = arith.constant 0 : index
    %c0_16 = arith.constant 0 : index
    %18 = vector.load %arg7[%c0_15, %c0_16] : memref<1x1xf32, #tpu.memory_space<vmem>>, vector<1x1xf32>
    %19 = vector.broadcast %18 : vector<1x1xf32> to vector<1x8xf32>
    %20 = arith.addf %17, %19 : vector<1x8xf32>
    %c0_17 = arith.constant 0 : index
    %c0_18 = arith.constant 0 : index
    %21 = vector.load %arg8[%c0_17, %c0_18] : memref<1x8xf32, #tpu.memory_space<vmem>>, vector<1x8xf32>
    tpu.vector_store %arg8[%c0_17, %c0_18], %20 {strides = array<i32>} : memref<1x8xf32, #tpu.memory_space<vmem>>, vector<1x8xf32>,
    return
  }
  func.func @transform_0(%arg0: i32) -> (i32, i32) {
    %c0_i32 = arith.constant 0 : i32
    %c0_i32_0 = arith.constant 0 : i32
    return %arg0, %c0_i32 : i32, i32
  }
  func.func @transform_1(%arg0: i32) -> (i32, i32) {
    %c0_i32 = arith.constant 0 : i32
    %c0_i32_0 = arith.constant 0 : i32
    %c0_i32_1 = arith.constant 0 : i32
    return %c0_i32, %c0_i32_0 : i32, i32
  }
  func.func @transform_2(%arg0: i32) -> (i32, i32) {
    %c0_i32 = arith.constant 0 : i32
    %c0_i32_0 = arith.constant 0 : i32
    %c0_i32_1 = arith.constant 0 : i32
    return %c0_i32, %c0_i32_0 : i32, i32
  }
  func.func @transform_3(%arg0: i32) -> (i32, i32) {
    %c0_i32 = arith.constant 0 : i32
    %c0_i32_0 = arith.constant 0 : i32
    %c0_i32_1 = arith.constant 0 : i32
    return %c0_i32, %c0_i32_0 : i32, i32
  }
  func.func @transform_4(%arg0: i32) -> (i32, i32) {
    %c0_i32 = arith.constant 0 : i32
    %c0_i32_0 = arith.constant 0 : i32
    %c0_i32_1 = arith.constant 0 : i32
    return %c0_i32, %c0_i32_0 : i32, i32
  }
  func.func @transform_5(%arg0: i32) -> (i32, i32) {
    %c0_i32 = arith.constant 0 : i32
    %c0_i32_0 = arith.constant 0 : i32
    %c0_i32_1 = arith.constant 0 : i32
    return %c0_i32, %c0_i32_0 : i32, i32
  }
  func.func @transform_6(%arg0: i32) -> (i32, i32) {
    %c0_i32 = arith.constant 0 : i32
    %c0_i32_0 = arith.constant 0 : i32
    %c0_i32_1 = arith.constant 0 : i32
    return %c0_i32, %c0_i32_0 : i32, i32
  }
  func.func @transform_7(%arg0: i32) -> (i32, i32) {
    %c0_i32 = arith.constant 0 : i32
    %c0_i32_0 = arith.constant 0 : i32
    return %c0_i32, %arg0 : i32, i32
  }
}

module attributes {stable_mosaic.version = 11 : i64} {
  func.func @_discriminator_kernel(%arg0: i32, %arg1: memref<8x64xbf16, #tpu.memory_space<vmem>>, %arg2: memref<64x16xbf16, #tpu.memory_space<vmem>>, %arg3: memref<16x4xbf16, #tpu.memory_space<vmem>>, %arg4: memref<1x4xf32, #tpu.memory_space<vmem>>, %arg5: memref<1x16xf32, #tpu.memory_space<vmem>>, %arg6: memref<1x4xf32, #tpu.memory_space<vmem>>, %arg7: memref<1x1xf32, #tpu.memory_space<vmem>>, %arg8: memref<1x8xf32, #tpu.memory_space<vmem>>) attributes {dimension_semantics = [#tpu.dimension_semantics<parallel>], iteration_bounds = array<i64: 1>, scalar_prefetch = 0 : i64, scratch_operands = 0 : i64, tpu.core_type = #tpu.core_type<tc>, window_params = [{transform_indices = @transform_0, window_bounds = array<i64: 8, 64>}, {pipeline_mode = #tpu.pipeline_mode<synchronous>, transform_indices = @transform_1, window_bounds = array<i64: 64, 16>}, {pipeline_mode = #tpu.pipeline_mode<synchronous>, transform_indices = @transform_2, window_bounds = array<i64: 16, 4>}, {pipeline_mode = #tpu.pipeline_mode<synchronous>, transform_indices = @transform_3, window_bounds = array<i64: 1, 4>}, {pipeline_mode = #tpu.pipeline_mode<synchronous>, transform_indices = @transform_4, window_bounds = array<i64: 1, 16>}, {pipeline_mode = #tpu.pipeline_mode<synchronous>, transform_indices = @transform_5, window_bounds = array<i64: 1, 4>}, {pipeline_mode = #tpu.pipeline_mode<synchronous>, transform_indices = @transform_6, window_bounds = array<i64: 1, 1>}, {transform_indices = @transform_7, window_bounds = array<i64: 1, 8>}]} {
    %c0 = arith.constant 0 : index
    %c0_0 = arith.constant 0 : index
    %0 = vector.load %arg1[%c0, %c0_0] : memref<8x64xbf16, #tpu.memory_space<vmem>>, vector<8x64xbf16>
    %c0_1 = arith.constant 0 : index
    %c0_2 = arith.constant 0 : index
    %1 = vector.load %arg2[%c0_1, %c0_2] : memref<64x16xbf16, #tpu.memory_space<vmem>>, vector<64x16xbf16>
    %cst = arith.constant dense<0.000000e+00> : vector<8x16xf32>
    %2 = tpu.matmul %0, %1, %cst {dimension_numbers = #tpu.dot_dimension_numbers<[1], [0], [0], [1], [0, 0, 1, 1], [], []>} : vector<8x64xbf16>, vector<64x16xbf16>, vector<8x16xf32> -> vector<8x16xf32>
    %c0_3 = arith.constant 0 : index
    %c0_4 = arith.constant 0 : index
    %3 = vector.load %arg5[%c0_3, %c0_4] : memref<1x16xf32, #tpu.memory_space<vmem>>, vector<1x16xf32>
    %4 = vector.broadcast %3 : vector<1x16xf32> to vector<8x16xf32>
    %5 = arith.addf %2, %4 : vector<8x16xf32>
    %cst_5 = arith.constant 0.000000e+00 : f32
    %6 = vector.broadcast %cst_5 : f32 to vector<8x16xf32>
    %7 = arith.maximumf %5, %6 : vector<8x16xf32>
    %8 = arith.truncf %7 : vector<8x16xf32> to vector<8x16xbf16>
    %c0_6 = arith.constant 0 : index
    %c0_7 = arith.constant 0 : index
    %9 = vector.load %arg3[%c0_6, %c0_7] : memref<16x4xbf16, #tpu.memory_space<vmem>>, vector<16x4xbf16>
    %cst_8 = arith.constant dense<0.000000e+00> : vector<8x4xf32>
    %10 = tpu.matmul %8, %9, %cst_8 {dimension_numbers = #tpu.dot_dimension_numbers<[1], [0], [0], [1], [0, 0, 1, 1], [], []>} : vector<8x16xbf16>, vector<16x4xbf16>, vector<8x4xf32> -> vector<8x4xf32>
    %c0_9 = arith.constant 0 : index
    %c0_10 = arith.constant 0 : index
    %11 = vector.load %arg6[%c0_9, %c0_10] : memref<1x4xf32, #tpu.memory_space<vmem>>, vector<1x4xf32>
    %12 = vector.broadcast %11 : vector<1x4xf32> to vector<8x4xf32>
    %13 = arith.addf %10, %12 : vector<8x4xf32>
    %cst_11 = arith.constant 0.000000e+00 : f32
    %14 = vector.broadcast %cst_11 : f32 to vector<8x4xf32>
    %15 = arith.maximumf %13, %14 : vector<8x4xf32>
    %c0_12 = arith.constant 0 : index
    %c0_13 = arith.constant 0 : index
    %16 = vector.load %arg4[%c0_12, %c0_13] : memref<1x4xf32, #tpu.memory_space<vmem>>, vector<1x4xf32>
    %cst_14 = arith.constant dense<0.000000e+00> : vector<1x8xf32>
    %17 = tpu.matmul %16, %15, %cst_14 {dimension_numbers = #tpu.dot_dimension_numbers<[1], [1], [0], [0], [0, 0, 1, 0], [], []>} : vector<1x4xf32>, vector<8x4xf32>, vector<1x8xf32> -> vector<1x8xf32>
    %c0_15 = arith.constant 0 : index
    %c0_16 = arith.constant 0 : index
    %18 = vector.load %arg7[%c0_15, %c0_16] : memref<1x1xf32, #tpu.memory_space<vmem>>, vector<1x1xf32>
    %19 = vector.broadcast %18 : vector<1x1xf32> to vector<1x8xf32>
    %20 = arith.addf %17, %19 : vector<1x8xf32>
    %c0_17 = arith.constant 0 : index
    %c0_18 = arith.constant 0 : index
    %21 = vector.load %arg8[%c0_17, %c0_18] : memref<1x8xf32, #tpu.memory_space<vmem>>, vector<1x8xf32>
    tpu.vector_store %arg8[%c0_17, %c0_18], %20 {strides = array<i32>} : memref<1x8xf32, #tpu.memory_space<vmem>>, vector<1x8xf32>,
    return
  }
  func.func @transform_0(%arg0: i32) -> (i32, i32) {
    %c0_i32 = arith.constant 0 : i32
    %c0_i32_0 = arith.constant 0 : i32
    return %arg0, %c0_i32 : i32, i32
  }
  func.func @transform_1(%arg0: i32) -> (i32, i32) {
    %c0_i32 = arith.constant 0 : i32
    %c0_i32_0 = arith.constant 0 : i32
    %c0_i32_1 = arith.constant 0 : i32
    return %c0_i32, %c0_i32_0 : i32, i32
  }
  func.func @transform_2(%arg0: i32) -> (i32, i32) {
    %c0_i32 = arith.constant 0 : i32
    %c0_i32_0 = arith.constant 0 : i32
    %c0_i32_1 = arith.constant 0 : i32
    return %c0_i32, %c0_i32_0 : i32, i32
  }
  func.func @transform_3(%arg0: i32) -> (i32, i32) {
    %c0_i32 = arith.constant 0 : i32
    %c0_i32_0 = arith.constant 0 : i32
    %c0_i32_1 = arith.constant 0 : i32
    return %c0_i32, %c0_i32_0 : i32, i32
  }
  func.func @transform_4(%arg0: i32) -> (i32, i32) {
    %c0_i32 = arith.constant 0 : i32
    %c0_i32_0 = arith.constant 0 : i32
    %c0_i32_1 = arith.constant 0 : i32
    return %c0_i32, %c0_i32_0 : i32, i32
  }
  func.func @transform_5(%arg0: i32) -> (i32, i32) {
    %c0_i32 = arith.constant 0 : i32
    %c0_i32_0 = arith.constant 0 : i32
    %c0_i32_1 = arith.constant 0 : i32
    return %c0_i32, %c0_i32_0 : i32, i32
  }
  func.func @transform_6(%arg0: i32) -> (i32, i32) {
    %c0_i32 = arith.constant 0 : i32
    %c0_i32_0 = arith.constant 0 : i32
    %c0_i32_1 = arith.constant 0 : i32
    return %c0_i32, %c0_i32_0 : i32, i32
  }
  func.func @transform_7(%arg0: i32) -> (i32, i32) {
    %c0_i32 = arith.constant 0 : i32
    %c0_i32_0 = arith.constant 0 : i32
    return %c0_i32, %arg0 : i32, i32
  }
}

</mosaic_0001>

<bundles_post_ra>
// kernel: tpu_custom_call.1
= control target key start
LH: loop header
LB: loop body
LE: loop exit
PB: predicated region body
PF: predicated region fallthrough
CT: control target
= control target key end

     0   :  { %s304_s0 = inlined_call_operand.vmem [shape: bf16[8,64], index: 0, kind: input, shape index: {}]   ;;  %s305_s1 = inlined_call_operand.vmem [shape: bf16[64,16], index: 1, kind: input, shape index: {}]   ;;  %s306_s2 = inlined_call_operand.vmem [shape: bf16[16,4], index: 2, kind: input, shape index: {}]   ;;  %s307_s3 = inlined_call_operand.vmem [shape: f32[1,4], index: 3, kind: input, shape index: {}]   ;;  %s308_s4 = inlined_call_operand.vmem [shape: f32[1,16], index: 4, kind: input, shape index: {}]   ;;  %s309_s5 = inlined_call_operand.vmem [shape: f32[1,4], index: 5, kind: input, shape index: {}]   ;;  %s310_s6 = inlined_call_operand.<no memory space> [shape: f32[1,1], index: 6, kind: input, shape index: {}]   ;;  %s311_s7 = inlined_call_operand.hbm [shape: f32[1,8], index: 7, kind: output, shape index: {}]  }
   0x1   :  { %v12_v0 = vstv %s310_s6 }
   0x2   :  { %13 = vst [vmem:[#allocation2] sm:$0x1] %v12_v0 }
   0x3   :  { %v196_v1 = vld [vmem:[%s305_s1 + $0x18] sm:$0xff]  ;;  %v195_v2 = vld [vmem:[%s305_s1 + $0x10] sm:$0xff] }
   0x4   :  { %75 = vmatpush.bf16.msra.mxu0 %v196_v1 }
   0x5   :  { %14 = vsyncpa [#allocation4], 0  ;;  %v194_v3 = vld [vmem:[%s305_s1 + $0x8] sm:$0xff]  ;;  %v193_v4 = vld [vmem:[%s305_s1] sm:$0xff]  ;;  %vm67_vm0 = vcmask 523264   ;;  %vm98_vm1 = vcmask 130048  }
   0x6   :  { %v30_v5 = vld [vmem:[%s304_s0] sm:$0xf]  ;;  %v229_v14 = vmov 0   ;;  %vm124_vm2 = vcmask 31744   ;;  %s230_s16 = smov [#allocation3]   ;;  %s160_s20 = sshll.u32 %s311_s7, 4  ;;  %s161_s20 = int_to_ptr.hbm [resolvable:$true] %s160_s20 }
   0x7   :  { %v197_v6 = vld [vmem:[%s306_s2] sm:$0xff]  ;;  %200 = vset.pattern.permute.xlu0 %v229_v14  ;;  %s158_s17 = sshll.u32 %s230_s16, 4  ;;  %vm151_vm3 = vcmask 57344   ;;  %s159_s17 = int_to_ptr.vmem [resolvable:$true] %s158_s17 }
   0x8   :  { %76 = vmatpush.bf16.msra.mxu0 %v195_v2  ;;  %109 = vmatpush.bf16.msra.mxu1 %v197_v6  ;;  %v201_v7 = vld [vmem:[%s308_s4] ss:$0 sm:$0xff] }
   0x9   :  { %v117_v13 = vld [vmem:[#allocation2] sm:$0x1] }
   0xa   :  { %120 = vperm.xlu0 %200, %v117_v13   ;;  %v202_v15 = vld [vmem:[%s309_s5] ss:$0 sm:$0xff] }
   0xb   :  { %v116_v19 = vld [vmem:[%s307_s3] sm:$0x1] }
   0xc   :  { %77 = vmatpush.bf16.msra.mxu0 %v194_v3 }
  0x10   :  { %78 = vmatpush.bf16.msra.mxu0 %v193_v4 }
  0x13   :  { %185 = vmatmul.msk.bf16.vlgmr.msra.gmra.mxu0 %vm67_vm0, %v30_v5 }
  0x7c   :  { %v121_v21 = vpop.permute.xlu0 %120 }
  0x7d   :  { %v123_v22 = vperm.slane %v121_v21, 0 }
  0x90   :  { %v80_v8 = vpop.f32.mrf.mxu0 }
  0x91   :  { %v81_v9 = vadd.f32 %v201_v7, %v80_v8 }
  0x93   :  { %v84_v10 = vmax.f32 %v81_v9, 0.0 }
  0x95   :  { %v85_v11 = vpack.c.bf16 %v84_v10, %v84_v10 }
  0x97   :  { %190 = vmatmul.msk.bf16.vlgmr.msra.gmra.mxu1 %vm98_vm1, %v85_v11 }
  0x98   :  { %v82_v12 = vpop.f32.mrf.mxu0 }
 0x114   :  { %v111_v16 = vpop.f32.mrf.mxu1 }
 0x115   :  { %v112_v17 = vadd.f32 %v202_v15, %v111_v16 }
 0x117   :  { %v115_v18 = vmax.f32 %v112_v17, 0.0 }
 0x119   :  { %191 = vmatpush.xpose.msk.msra.mxu2 %vm124_vm2, %v115_v18 }
 0x11c   :  { %v113_v20 = vpop.f32.mrf.mxu1  ;;  %192 = vmatmul.msk.f32.vlgmr.msra.gmra.mxu2 %vm124_vm2, %v116_v19 }
 0x19f   :  { %v148_v23 = vpop.f32.mrf.mxu2 }
 0x1a0   :  { %v149_v24 = vadd.f32 %v148_v23, %v123_v22 }
 0x1a2   :  { %152 = vst.msk [vmem:[#allocation3] sm:$0x1] %vm151_vm3, %v149_v24 }
 0x1a3   :  { %163 = dma.vmem_to_hbm [thread:$0]  %s159_s17, 16, %s161_s20, [#allocation4]  }
 0x1a4   :  { %227 = dma.done.wait [#allocation4], 16  }
 0x1a5   :  { %228 = vsyncadd [#allocation4], 4294967280 }
 0x1a6   :  { %168 = vsyncpa [#allocation4], 1 }

// kernel: tpu_custom_call.1
= control target key start
LH: loop header
LB: loop body
LE: loop exit
PB: predicated region body
PF: predicated region fallthrough
CT: control target
= control target key end

     0   :  { %s304_s0 = inlined_call_operand.vmem [shape: bf16[8,64], index: 0, kind: input, shape index: {}]   ;;  %s305_s1 = inlined_call_operand.vmem [shape: bf16[64,16], index: 1, kind: input, shape index: {}]   ;;  %s306_s2 = inlined_call_operand.vmem [shape: bf16[16,4], index: 2, kind: input, shape index: {}]   ;;  %s307_s3 = inlined_call_operand.vmem [shape: f32[1,4], index: 3, kind: input, shape index: {}]   ;;  %s308_s4 = inlined_call_operand.vmem [shape: f32[1,16], index: 4, kind: input, shape index: {}]   ;;  %s309_s5 = inlined_call_operand.vmem [shape: f32[1,4], index: 5, kind: input, shape index: {}]   ;;  %s310_s6 = inlined_call_operand.<no memory space> [shape: f32[1,1], index: 6, kind: input, shape index: {}]   ;;  %s311_s7 = inlined_call_operand.hbm [shape: f32[1,8], index: 7, kind: output, shape index: {}]  }
   0x1   :  { %v12_v0 = vstv %s310_s6 }
   0x2   :  { %13 = vst [vmem:[#allocation2] sm:$0x1] %v12_v0 }
   0x3   :  { %v196_v1 = vld [vmem:[%s305_s1 + $0x18] sm:$0xff]  ;;  %v195_v2 = vld [vmem:[%s305_s1 + $0x10] sm:$0xff] }
   0x4   :  { %75 = vmatpush.bf16.msra.mxu0 %v196_v1 }
   0x5   :  { %14 = vsyncpa [#allocation4], 0  ;;  %v194_v3 = vld [vmem:[%s305_s1 + $0x8] sm:$0xff]  ;;  %v193_v4 = vld [vmem:[%s305_s1] sm:$0xff]  ;;  %vm67_vm0 = vcmask 523264   ;;  %vm98_vm1 = vcmask 130048  }
   0x6   :  { %v30_v5 = vld [vmem:[%s304_s0] sm:$0xf]  ;;  %v229_v14 = vmov 0   ;;  %vm124_vm2 = vcmask 31744   ;;  %s230_s16 = smov [#allocation3]   ;;  %s160_s20 = sshll.u32 %s311_s7, 4  ;;  %s161_s20 = int_to_ptr.hbm [resolvable:$true] %s160_s20 }
   0x7   :  { %v197_v6 = vld [vmem:[%s306_s2] sm:$0xff]  ;;  %200 = vset.pattern.permute.xlu0 %v229_v14  ;;  %s158_s17 = sshll.u32 %s230_s16, 4  ;;  %vm151_vm3 = vcmask 57344   ;;  %s159_s17 = int_to_ptr.vmem [resolvable:$true] %s158_s17 }
   0x8   :  { %76 = vmatpush.bf16.msra.mxu0 %v195_v2  ;;  %109 = vmatpush.bf16.msra.mxu1 %v197_v6  ;;  %v201_v7 = vld [vmem:[%s308_s4] ss:$0 sm:$0xff] }
   0x9   :  { %v117_v13 = vld [vmem:[#allocation2] sm:$0x1] }
   0xa   :  { %120 = vperm.xlu0 %200, %v117_v13   ;;  %v202_v15 = vld [vmem:[%s309_s5] ss:$0 sm:$0xff] }
   0xb   :  { %v116_v19 = vld [vmem:[%s307_s3] sm:$0x1] }
   0xc   :  { %77 = vmatpush.bf16.msra.mxu0 %v194_v3 }
  0x10   :  { %78 = vmatpush.bf16.msra.mxu0 %v193_v4 }
  0x13   :  { %185 = vmatmul.msk.bf16.vlgmr.msra.gmra.mxu0 %vm67_vm0, %v30_v5 }
  0x7c   :  { %v121_v21 = vpop.permute.xlu0 %120 }
  0x7d   :  { %v123_v22 = vperm.slane %v121_v21, 0 }
  0x90   :  { %v80_v8 = vpop.f32.mrf.mxu0 }
  0x91   :  { %v81_v9 = vadd.f32 %v201_v7, %v80_v8 }
  0x93   :  { %v84_v10 = vmax.f32 %v81_v9, 0.0 }
  0x95   :  { %v85_v11 = vpack.c.bf16 %v84_v10, %v84_v10 }
  0x97   :  { %190 = vmatmul.msk.bf16.vlgmr.msra.gmra.mxu1 %vm98_vm1, %v85_v11 }
  0x98   :  { %v82_v12 = vpop.f32.mrf.mxu0 }
 0x114   :  { %v111_v16 = vpop.f32.mrf.mxu1 }
 0x115   :  { %v112_v17 = vadd.f32 %v202_v15, %v111_v16 }
 0x117   :  { %v115_v18 = vmax.f32 %v112_v17, 0.0 }
 0x119   :  { %191 = vmatpush.xpose.msk.msra.mxu2 %vm124_vm2, %v115_v18 }
 0x11c   :  { %v113_v20 = vpop.f32.mrf.mxu1  ;;  %192 = vmatmul.msk.f32.vlgmr.msra.gmra.mxu2 %vm124_vm2, %v116_v19 }
 0x19f   :  { %v148_v23 = vpop.f32.mrf.mxu2 }
 0x1a0   :  { %v149_v24 = vadd.f32 %v148_v23, %v123_v22 }
 0x1a2   :  { %152 = vst.msk [vmem:[#allocation3] sm:$0x1] %vm151_vm3, %v149_v24 }
 0x1a3   :  { %163 = dma.vmem_to_hbm [thread:$0]  %s159_s17, 16, %s161_s20, [#allocation4]  }
 0x1a4   :  { %227 = dma.done.wait [#allocation4], 16  }
 0x1a5   :  { %228 = vsyncadd [#allocation4], 4294967280 }
 0x1a6   :  { %168 = vsyncpa [#allocation4], 1 }

</bundles_post_ra>
